<compile_context>
chip_gen: v7x
topology: tpu7x:2x2x1
jax: 0.10.0
libtpu: 0.0.40
codegen_flags: <defaults>
</compile_context>

<pallas_src>
import math

import numpy as np
import jax
import jax.numpy as jnp
from jax import lax
from jax.experimental import pallas as pl
from jax.experimental.pallas import tpu as pltpu

# ----------------------------- small config ---------------------------------
B, S, H = 2, 8, 32          # batch, seq_len, hidden_size
NH = 4                      # num attention heads (no GQA: kv heads == NH)
HD = H // NH                # head_dim = 8
INTER = 64                  # LlamaMLP intermediate size
ADP_HD = 8                  # adapter hidden_dim
RMS_EPS = 1e-6
ROPE_THETA = 10000.0
ADAPTER_ATTN_NONLINEAR = True   # adapter_attn uses SiLU; adapter_mlp is Identity

N = B * S
# Plain Python float so it lowers as a jaxpr literal (torch.finfo(float32).min).
NEG_INF = -2.3819763e38

# -------------------- packed constant-slab row offsets -----------------------
# slab "c32": width H (=32) constants stacked along sublanes (all offsets % 8 == 0)
ROW_LN1, ROW_LN2 = 0, 8          # RMSNorm weights
ROW_ADA_BB, ROW_ADM_BB = 16, 24  # adapter up-proj biases (adm row pre-folds its down bias)
ROW_ADA_BA = 32                  # attn-adapter down bias, zero-padded 8 -> 32 lanes
R_ADA_WA, R_ADM_WA = 40, 72      # adapter down weights (H, ADP_HD) zero-padded to (H, H)
R_ADA_WB, R_ADM_WB = 104, 136    # adapter up weights (ADP_HD, H) zero-padded to (H, H)
R_WO = 168                       # o_proj (H, H)
R_WD = 200                       # down_proj padded to (2*INTER, H), bottom INTER rows zero
R_HMASK = 328                    # (NH*N, H) block-diagonal 0/1 head mask
R_ABIAS = 392                    # (NH*N, H) additive 0 / -inf causal+batch bias (first N lanes)
R_PREP = 456                     # (NH*N, H) one-hot replication matrix (first N lanes)
ROWS32 = 520

# slab "c256": width 256 (exactly 2 lane tiles)
R_QKVR = 0    # (H, 256) = [q*scale | k | v | 0 | (q*scale)@R | k@R | 0]
R_COS = 32    # (N, 256) cos table (1.0 over the v columns)
R_SIN = 48    # (N, 256) sin table
R_WGU = 64    # (H, 256) = [w_gate | w_up | 0]
ROWS256 = 96
W256 = 256


# ------------------------------ kernel helpers -------------------------------
def _rmsnorm(x, w, eps):
    var = jnp.mean(x * x, axis=-1, keepdims=True)
    return x * lax.rsqrt(var + eps) * w


def _silu(x):
    return x * jax.nn.sigmoid(x)


# ------------------------------ fused Pallas kernel --------------------------
def decoder_layer_kernel(x_ref, c32_ref, c256_ref, o_ref):
    f32 = jnp.float32
    x = x_ref[...]                                                 # (N, H) residual #1

    # ---------- stage 1: input RMSNorm + adapter_attn (SiLU) -----------------
    xn = _rmsnorm(x, c32_ref[ROW_LN1:ROW_LN1 + 1, :], RMS_EPS)
    down1 = (jnp.dot(xn, c32_ref[R_ADA_WA:R_ADA_WA + H, :], preferred_element_type=f32)
             + c32_ref[ROW_ADA_BA:ROW_ADA_BA + 1, :])              # cols >= ADP_HD are exactly 0
    if ADAPTER_ATTN_NONLINEAR:
        down1 = _silu(down1)
    h_pre = (jnp.dot(down1, c32_ref[R_ADA_WB:R_ADA_WB + H, :], preferred_element_type=f32)
             + c32_ref[ROW_ADA_BB:ROW_ADA_BB + 1, :] + xn)         # adapter residual = norm output

    # ---------- stage 2: self-attention (RoPE + causal softmax) + residual ----
    proj = jnp.dot(h_pre, c256_ref[R_QKVR:R_QKVR + H, :],
                   preferred_element_type=f32)                     # (N, 256)
    # RoPE on the packed projection: rot columns sit exactly one lane tile (128)
    # to the right of their q/k columns, so a tile-aligned roll lines them up and
    # two wide FMAs apply cos/sin (v passes through via cos == 1, sin == 0).
    proj = (proj * c256_ref[R_COS:R_COS + N, :]
            + pltpu.roll(proj, shift=128, axis=1) * c256_ref[R_SIN:R_SIN + N, :])
    q = proj[:, 0:H]
    k = proj[:, H:2 * H]
    v = proj[:, 2 * H:3 * H]

    # Block-diagonal head-batched attention (no per-head loop, no transposes).
    hm = c32_ref[R_HMASK:R_HMASK + NH * N, :]                      # (NH*N, H) 0/1 head mask
    rep = c32_ref[R_PREP:R_PREP + NH * N, :N]                      # (NH*N, N) one-hot replication
    q_exp = jnp.dot(rep, q, preferred_element_type=f32) * hm       # q repeated per head, masked
    scores = lax.dot_general(q_exp, k, (((1,), (1,)), ((), ())),
                             preferred_element_type=f32)           # (NH*N, N)
    scores = scores + c32_ref[R_ABIAS:R_ABIAS + NH * N, :N]        # precomputed 0 / -inf bias

    m = jnp.max(scores, axis=-1, keepdims=True)
    e = jnp.exp(scores - m)
    l = jnp.sum(e, axis=-1, keepdims=True)
    p = e * pl.reciprocal(l, approx=True)                          # EUP reciprocal

    ctx_exp = jnp.dot(p, v, preferred_element_type=f32) * hm       # (NH*N, H)
    ctx = (ctx_exp[0:N] + ctx_exp[N:2 * N]                         # sublane-aligned head collapse
           + ctx_exp[2 * N:3 * N] + ctx_exp[3 * N:4 * N])
    attn_out = jnp.dot(ctx, c32_ref[R_WO:R_WO + H, :], preferred_element_type=f32)
    h_attn = x + attn_out                                          # residual #1

    # ---------- stage 3: post RMSNorm + adapter_mlp (Identity) + LlamaMLP -----
    xn2 = _rmsnorm(h_attn, c32_ref[ROW_LN2:ROW_LN2 + 1, :], RMS_EPS)
    down2 = jnp.dot(xn2, c32_ref[R_ADM_WA:R_ADM_WA + H, :], preferred_element_type=f32)
    a = (jnp.dot(down2, c32_ref[R_ADM_WB:R_ADM_WB + H, :], preferred_element_type=f32)
         + c32_ref[ROW_ADM_BB:ROW_ADM_BB + 1, :] + xn2)            # down bias folded into this row

    gu = jnp.dot(a, c256_ref[R_WGU:R_WGU + H, :],
                 preferred_element_type=f32)[:, :2 * INTER]        # (N, 128), lane-dense
    z = _silu(gu) * pltpu.roll(gu, shift=INTER, axis=1)            # [silu(gate)*up | junk]
    mlp = jnp.dot(z, c32_ref[R_WD:R_WD + 2 * INTER, :],
                  preferred_element_type=f32)                      # junk cols hit zero wd rows

    o_ref[...] = h_attn + mlp                                      # residual #2


# ------------------------------ pallas_call wrapper ---------------------------
@jax.jit
def llama_adapter_decoder_layer(x, c32, c256):
    """x: (B, S, H) f32; c32/c256: packed constant slabs -> (B, S, H) f32."""
    x2d = x.reshape(N, H)
    vmem = pl.BlockSpec(memory_space=pltpu.MemorySpace.VMEM)
    out = pl.pallas_call(
        decoder_layer_kernel,
        out_shape=jax.ShapeDtypeStruct((N, H), jnp.float32),
        in_specs=[vmem, vmem, vmem],
        out_specs=vmem,
    )(x2d, c32, c256)
    return out.reshape(B, S, H)


# ----------------------- one-time parameter folding ---------------------------
def _rotate_half_matrix():
    """Constant (H, H) matrix R with (x @ R) == per-head rotate_half(x)."""
    R = np.zeros((H, H), np.float32)
    for h in range(NH):
        base = h * HD
        for d in range(HD // 2):
            R[base + d + HD // 2, base + d] = -1.0   # out[..., :HD/2] = -x[..., HD/2:]
            R[base + d, base + d + HD // 2] = 1.0    # out[..., HD/2:] =  x[..., :HD/2]
    return R


def fuse_params(p):
    """Host-side constant folding + operand packing into two slabs."""
    pn = {k: np.asarray(v, np.float32) for k, v in p.items()}
    scale = 1.0 / math.sqrt(HD)
    R = _rotate_half_matrix()
    wq_s = pn['wq'] * scale

    # -------- width-32 slab --------
    c32 = np.zeros((ROWS32, H), np.float32)
    c32[ROW_LN1] = pn['ln1_w']
    c32[ROW_LN2] = pn['ln2_w']
    c32[ROW_ADA_BB] = pn['ada_bb']
    # adapter_mlp activation is Identity -> fold its down bias through the up weight
    c32[ROW_ADM_BB] = pn['adm_ba'] @ pn['adm_wb'] + pn['adm_bb']
    c32[ROW_ADA_BA, :ADP_HD] = pn['ada_ba']
    c32[R_ADA_WA:R_ADA_WA + H, :ADP_HD] = pn['ada_wa']
    c32[R_ADM_WA:R_ADM_WA + H, :ADP_HD] = pn['adm_wa']
    c32[R_ADA_WB:R_ADA_WB + ADP_HD, :] = pn['ada_wb']
    c32[R_ADM_WB:R_ADM_WB + ADP_HD, :] = pn['adm_wb']
    c32[R_WO:R_WO + H, :] = pn['wo']
    c32[R_WD:R_WD + INTER, :] = pn['wd']
    # block-diagonal head mask
    r = np.arange(NH * N)[:, None]
    c = np.arange(H)[None, :]
    c32[R_HMASK:R_HMASK + NH * N, :] = ((r // N) == (c // HD)).astype(np.float32)
    # additive causal + same-batch bias (0 where allowed, -inf elsewhere)
    qi = np.arange(NH * N)[:, None] % N
    kj = np.arange(N)[None, :]
    allowed = ((qi // S) == (kj // S)) & ((kj % S) <= (qi % S))
    c32[R_ABIAS:R_ABIAS + NH * N, :N] = np.where(allowed, 0.0, NEG_INF)
    # one-hot replication matrix: row h*N+i picks q[i]
    rows = np.arange(NH * N)
    c32[R_PREP + rows, rows % N] = 1.0

    # -------- width-256 slab --------
    c256 = np.zeros((ROWS256, W256), np.float32)
    c256[R_QKVR:R_QKVR + H, 0 * H:1 * H] = wq_s
    c256[R_QKVR:R_QKVR + H, 1 * H:2 * H] = pn['wk']
    c256[R_QKVR:R_QKVR + H, 2 * H:3 * H] = pn['wv']
    c256[R_QKVR:R_QKVR + H, 4 * H:5 * H] = wq_s @ R        # cols 128:160 (tile 1)
    c256[R_QKVR:R_QKVR + H, 5 * H:6 * H] = pn['wk'] @ R    # cols 160:192
    cos_n = np.tile(np.tile(pn['cos'], (1, NH)), (B, 1))   # (N, H)
    sin_n = np.tile(np.tile(pn['sin'], (1, NH)), (B, 1))
    c256[R_COS:R_COS + N, 0:H] = cos_n
    c256[R_COS:R_COS + N, H:2 * H] = cos_n
    c256[R_COS:R_COS + N, 2 * H:3 * H] = 1.0               # v columns pass through
    c256[R_SIN:R_SIN + N, 0:H] = sin_n
    c256[R_SIN:R_SIN + N, H:2 * H] = sin_n
    c256[R_WGU:R_WGU + H, :INTER] = pn['wg']
    c256[R_WGU:R_WGU + H, INTER:2 * INTER] = pn['wu']

    return jnp.asarray(c32), jnp.asarray(c256)


# ------------------------------ pure-JAX reference ----------------------------
def reference(x, p):
    def rms(v, w):
        return v * lax.rsqrt(jnp.mean(v * v, -1, keepdims=True) + RMS_EPS) * w

    def rot_half(v):
        return jnp.concatenate([-v[..., HD // 2:], v[..., :HD // 2]], -1)

    x2d = x.reshape(N, H)
    xn = rms(x2d, p['ln1_w'])
    d = xn @ p['ada_wa'] + p['ada_ba']
    if ADAPTER_ATTN_NONLINEAR:
        d = d * jax.nn.sigmoid(d)
    h_pre = d @ p['ada_wb'] + p['ada_bb'] + xn

    q = (h_pre @ p['wq']).reshape(B, S, NH, HD).transpose(0, 2, 1, 3)
    k = (h_pre @ p['wk']).reshape(B, S, NH, HD).transpose(0, 2, 1, 3)
    v = (h_pre @ p['wv']).reshape(B, S, NH, HD).transpose(0, 2, 1, 3)
    cos, sin = p['cos'][None, None], p['sin'][None, None]
    q = q * cos + rot_half(q) * sin
    k = k * cos + rot_half(k) * sin
    s = jnp.einsum('bhqd,bhkd->bhqk', q, k) / math.sqrt(HD)
    mask = jnp.tril(jnp.ones((S, S), bool))
    s = jnp.where(mask[None, None], s, NEG_INF)
    pr = jax.nn.softmax(s, -1)
    ctx = jnp.einsum('bhqk,bhkd->bhqd', pr, v).transpose(0, 2, 1, 3).reshape(N, H)
    h_attn = x2d + ctx @ p['wo']

    xn2 = rms(h_attn, p['ln2_w'])
    a = (xn2 @ p['adm_wa'] + p['adm_ba']) @ p['adm_wb'] + p['adm_bb'] + xn2
    g = a @ p['wg']
    mlp = ((g * jax.nn.sigmoid(g)) * (a @ p['wu'])) @ p['wd']
    return (h_attn + mlp).reshape(B, S, H)


# ------------------------------ main ------------------------------------------
if __name__ == "__main__":
    key = jax.random.PRNGKey(0)
    ks = jax.random.split(key, 18)

    def w(k, shape, scale=0.05):
        return (scale * jax.random.normal(k, shape)).astype(jnp.float32)

    # RoPE tables (glue, computed in plain JAX)
    inv_freq = 1.0 / (ROPE_THETA ** (jnp.arange(0, HD, 2, dtype=jnp.float32) / HD))
    pos = jnp.arange(S, dtype=jnp.float32)
    freqs = pos[:, None] * inv_freq[None, :]
    emb = jnp.concatenate([freqs, freqs], axis=-1)          # (S, HD)

    raw_params = {
        'ln1_w': (1.0 + 0.1 * jax.random.normal(ks[16], (H,))).astype(jnp.float32),
        'ln2_w': (1.0 + 0.1 * jax.random.normal(ks[17], (H,))).astype(jnp.float32),
        # adapter_attn (Linear weights stored as (in, out))
        'ada_wa': w(ks[0], (H, ADP_HD)), 'ada_ba': w(ks[1], (ADP_HD,)),
        'ada_wb': w(ks[2], (ADP_HD, H)), 'ada_bb': w(ks[3], (H,)),
        # attention projections (no bias, Llama default)
        'wq': w(ks[4], (H, H)), 'wk': w(ks[5], (H, H)),
        'wv': w(ks[6], (H, H)), 'wo': w(ks[7], (H, H)),
        'cos': jnp.cos(emb), 'sin': jnp.sin(emb),
        # adapter_mlp
        'adm_wa': w(ks[8], (H, ADP_HD)), 'adm_ba': w(ks[9], (ADP_HD,)),
        'adm_wb': w(ks[10], (ADP_HD, H)), 'adm_bb': w(ks[11], (H,)),
        # LlamaMLP (SwiGLU, no bias)
        'wg': w(ks[12], (H, INTER)), 'wu': w(ks[13], (H, INTER)),
        'wd': w(ks[14], (INTER, H)),
    }

    x = jax.random.normal(ks[15], (B, S, H), jnp.float32)

    c32, c256 = fuse_params(raw_params)
    out = jax.block_until_ready(llama_adapter_decoder_layer(x, c32, c256))
    ref = reference(x, raw_params)

    assert out.shape == (B, S, H)
    assert bool(jnp.all(jnp.isfinite(out)))
    # tolerance covers the approx EUP reciprocal in the softmax normalize
    assert bool(jnp.allclose(out, ref, rtol=2e-3, atol=2e-3)), "mismatch vs reference"
    print("KERNEL_OK")
</pallas_src>

<mosaic_0001>
module attributes {stable_mosaic.version = 11 : i64} {
  func.func @decoder_layer_kernel(%arg0: memref<16x32xf32, #tpu.memory_space<vmem>>, %arg1: memref<520x32xf32, #tpu.memory_space<vmem>>, %arg2: memref<96x256xf32, #tpu.memory_space<vmem>>, %arg3: memref<16x32xf32, #tpu.memory_space<vmem>>) attributes {dimension_semantics = [], scalar_prefetch = 0 : i64, scratch_operands = 0 : i64, tpu.core_type = #tpu.core_type<tc>} {
    %c0 = arith.constant 0 : index
    %c0_0 = arith.constant 0 : index
    %0 = vector.load %arg0[%c0, %c0_0] : memref<16x32xf32, #tpu.memory_space<vmem>>, vector<16x32xf32>
    %c0_1 = arith.constant 0 : index
    %c0_2 = arith.constant 0 : index
    %1 = vector.load %arg1[%c0_1, %c0_2] : memref<520x32xf32, #tpu.memory_space<vmem>>, vector<1x32xf32>
    %2 = arith.mulf %0, %0 : vector<16x32xf32>
    %cst = arith.constant dense<0.000000e+00> : vector<16xf32>
    %3 = vector.multi_reduction <add>, %2, %cst [1] : vector<16x32xf32> to vector<16xf32>
    %4 = vector.shape_cast %3 : vector<16xf32> to vector<16x1xf32>
    %cst_3 = arith.constant 3.200000e+01 : f32
    %5 = vector.broadcast %cst_3 : f32 to vector<16x1xf32>
    %6 = arith.divf %4, %5 : vector<16x1xf32>
    %cst_4 = arith.constant 9.99999997E-7 : f32
    %7 = vector.broadcast %cst_4 : f32 to vector<16x1xf32>
    %8 = arith.addf %6, %7 : vector<16x1xf32>
    %9 = math.rsqrt %8 : vector<16x1xf32>
    %10 = vector.broadcast %9 : vector<16x1xf32> to vector<16x32xf32>
    %11 = arith.mulf %0, %10 : vector<16x32xf32>
    %12 = vector.broadcast %1 : vector<1x32xf32> to vector<16x32xf32>
    %13 = arith.mulf %11, %12 : vector<16x32xf32>
    %c40 = arith.constant 40 : index
    %c0_5 = arith.constant 0 : index
    %14 = vector.load %arg1[%c40, %c0_5] : memref<520x32xf32, #tpu.memory_space<vmem>>, vector<32x32xf32>
    %cst_6 = arith.constant dense<0.000000e+00> : vector<16x32xf32>
    %15 = tpu.matmul %13, %14, %cst_6 {dimension_numbers = #tpu.dot_dimension_numbers<[1], [0], [0], [1], [0, 0, 1, 1], [], []>} : vector<16x32xf32>, vector<32x32xf32>, vector<16x32xf32> -> vector<16x32xf32>
    %c32 = arith.constant 32 : index
    %c0_7 = arith.constant 0 : index
    %16 = vector.load %arg1[%c32, %c0_7] : memref<520x32xf32, #tpu.memory_space<vmem>>, vector<1x32xf32>
    %17 = vector.broadcast %16 : vector<1x32xf32> to vector<16x32xf32>
    %18 = arith.addf %15, %17 : vector<16x32xf32>
    %19 = arith.negf %18 : vector<16x32xf32>
    %20 = math.exp %19 : vector<16x32xf32>
    %cst_8 = arith.constant 1.000000e+00 : f32
    %21 = vector.broadcast %cst_8 : f32 to vector<16x32xf32>
    %22 = arith.addf %21, %20 : vector<16x32xf32>
    %23 = arith.divf %21, %22 : vector<16x32xf32>
    %24 = arith.mulf %18, %23 : vector<16x32xf32>
    %c104 = arith.constant 104 : index
    %c0_9 = arith.constant 0 : index
    %25 = vector.load %arg1[%c104, %c0_9] : memref<520x32xf32, #tpu.memory_space<vmem>>, vector<32x32xf32>
    %cst_10 = arith.constant dense<0.000000e+00> : vector<16x32xf32>
    %26 = tpu.matmul %24, %25, %cst_10 {dimension_numbers = #tpu.dot_dimension_numbers<[1], [0], [0], [1], [0, 0, 1, 1], [], []>} : vector<16x32xf32>, vector<32x32xf32>, vector<16x32xf32> -> vector<16x32xf32>
    %c16 = arith.constant 16 : index
    %c0_11 = arith.constant 0 : index
    %27 = vector.load %arg1[%c16, %c0_11] : memref<520x32xf32, #tpu.memory_space<vmem>>, vector<1x32xf32>
    %28 = vector.broadcast %27 : vector<1x32xf32> to vector<16x32xf32>
    %29 = arith.addf %26, %28 : vector<16x32xf32>
    %30 = arith.addf %29, %13 : vector<16x32xf32>
    %c0_12 = arith.constant 0 : index
    %c0_13 = arith.constant 0 : index
    %31 = vector.load %arg2[%c0_12, %c0_13] : memref<96x256xf32, #tpu.memory_space<vmem>>, vector<32x256xf32>
    %cst_14 = arith.constant dense<0.000000e+00> : vector<16x256xf32>
    %32 = tpu.matmul %30, %31, %cst_14 {dimension_numbers = #tpu.dot_dimension_numbers<[1], [0], [0], [1], [0, 0, 1, 1], [], []>} : vector<16x32xf32>, vector<32x256xf32>, vector<16x256xf32> -> vector<16x256xf32>
    %c32_15 = arith.constant 32 : index
    %c0_16 = arith.constant 0 : index
    %33 = vector.load %arg2[%c32_15, %c0_16] : memref<96x256xf32, #tpu.memory_space<vmem>>, vector<16x256xf32>
    %34 = arith.mulf %32, %33 : vector<16x256xf32>
    %c128_i32 = arith.constant 128 : i32
    %35 = tpu.dynamic_rotate %32 by %c128_i32 dim 1 : vector<16x256xf32>, i32 -> vector<16x256xf32>
    %c48 = arith.constant 48 : index
    %c0_17 = arith.constant 0 : index
    %36 = vector.load %arg2[%c48, %c0_17] : memref<96x256xf32, #tpu.memory_space<vmem>>, vector<16x256xf32>
    %37 = arith.mulf %35, %36 : vector<16x256xf32>
    %38 = arith.addf %34, %37 : vector<16x256xf32>
    %39 = vector.extract_strided_slice %38 {offsets = [0, 0], sizes = [16, 32], strides = [1, 1]} : vector<16x256xf32> to vector<16x32xf32>
    %40 = vector.extract_strided_slice %38 {offsets = [0, 32], sizes = [16, 32], strides = [1, 1]} : vector<16x256xf32> to vector<16x32xf32>
    %41 = vector.extract_strided_slice %38 {offsets = [0, 64], sizes = [16, 32], strides = [1, 1]} : vector<16x256xf32> to vector<16x32xf32>
    %c328 = arith.constant 328 : index
    %c0_18 = arith.constant 0 : index
    %42 = vector.load %arg1[%c328, %c0_18] : memref<520x32xf32, #tpu.memory_space<vmem>>, vector<64x32xf32>
    %c456 = arith.constant 456 : index
    %c0_19 = arith.constant 0 : index
    %43 = vector.load %arg1[%c456, %c0_19] : memref<520x32xf32, #tpu.memory_space<vmem>>, vector<64x16xf32>
    %cst_20 = arith.constant dense<0.000000e+00> : vector<64x32xf32>
    %44 = tpu.matmul %43, %39, %cst_20 {dimension_numbers = #tpu.dot_dimension_numbers<[1], [0], [0], [1], [0, 0, 1, 1], [], []>} : vector<64x16xf32>, vector<16x32xf32>, vector<64x32xf32> -> vector<64x32xf32>
    %45 = arith.mulf %44, %42 : vector<64x32xf32>
    %cst_21 = arith.constant dense<0.000000e+00> : vector<64x16xf32>
    %46 = tpu.matmul %45, %40, %cst_21 {dimension_numbers = #tpu.dot_dimension_numbers<[1], [1], [0], [0], [0, 0, 1, 0], [], []>} : vector<64x32xf32>, vector<16x32xf32>, vector<64x16xf32> -> vector<64x16xf32>
    %c392 = arith.constant 392 : index
    %c0_22 = arith.constant 0 : index
    %47 = vector.load %arg1[%c392, %c0_22] : memref<520x32xf32, #tpu.memory_space<vmem>>, vector<64x16xf32>
    %48 = arith.addf %46, %47 : vector<64x16xf32>
    %cst_23 = arith.constant dense<0xFF800000> : vector<64xf32>
    %49 = vector.multi_reduction <maximumf>, %48, %cst_23 [1] : vector<64x16xf32> to vector<64xf32>
    %50 = vector.shape_cast %49 : vector<64xf32> to vector<64x1xf32>
    %51 = vector.broadcast %50 : vector<64x1xf32> to vector<64x16xf32>
    %52 = arith.subf %48, %51 : vector<64x16xf32>
    %53 = math.exp %52 : vector<64x16xf32>
    %cst_24 = arith.constant dense<0.000000e+00> : vector<64xf32>
    %54 = vector.multi_reduction <add>, %53, %cst_24 [1] : vector<64x16xf32> to vector<64xf32>
    %55 = vector.shape_cast %54 : vector<64xf32> to vector<64x1xf32>
    %56 = tpu.reciprocal %55 {approx = true} : vector<64x1xf32> -> vector<64x1xf32>
    %57 = vector.broadcast %56 : vector<64x1xf32> to vector<64x16xf32>
    %58 = arith.mulf %53, %57 : vector<64x16xf32>
    %cst_25 = arith.constant dense<0.000000e+00> : vector<64x32xf32>
    %59 = tpu.matmul %58, %41, %cst_25 {dimension_numbers = #tpu.dot_dimension_numbers<[1], [0], [0], [1], [0, 0, 1, 1], [], []>} : vector<64x16xf32>, vector<16x32xf32>, vector<64x32xf32> -> vector<64x32xf32>
    %60 = arith.mulf %59, %42 : vector<64x32xf32>
    %61 = vector.extract_strided_slice %60 {offsets = [0, 0], sizes = [16, 32], strides = [1, 1]} : vector<64x32xf32> to vector<16x32xf32>
    %62 = vector.extract_strided_slice %60 {offsets = [16, 0], sizes = [16, 32], strides = [1, 1]} : vector<64x32xf32> to vector<16x32xf32>
    %63 = arith.addf %61, %62 : vector<16x32xf32>
    %64 = vector.extract_strided_slice %60 {offsets = [32, 0], sizes = [16, 32], strides = [1, 1]} : vector<64x32xf32> to vector<16x32xf32>
    %65 = arith.addf %63, %64 : vector<16x32xf32>
    %66 = vector.extract_strided_slice %60 {offsets = [48, 0], sizes = [16, 32], strides = [1, 1]} : vector<64x32xf32> to vector<16x32xf32>
    %67 = arith.addf %65, %66 : vector<16x32xf32>
    %c168 = arith.constant 168 : index
    %c0_26 = arith.constant 0 : index
    %68 = vector.load %arg1[%c168, %c0_26] : memref<520x32xf32, #tpu.memory_space<vmem>>, vector<32x32xf32>
    %cst_27 = arith.constant dense<0.000000e+00> : vector<16x32xf32>
    %69 = tpu.matmul %67, %68, %cst_27 {dimension_numbers = #tpu.dot_dimension_numbers<[1], [0], [0], [1], [0, 0, 1, 1], [], []>} : vector<16x32xf32>, vector<32x32xf32>, vector<16x32xf32> -> vector<16x32xf32>
    %70 = arith.addf %0, %69 : vector<16x32xf32>
    %c8 = arith.constant 8 : index
    %c0_28 = arith.constant 0 : index
    %71 = vector.load %arg1[%c8, %c0_28] : memref<520x32xf32, #tpu.memory_space<vmem>>, vector<1x32xf32>
    %72 = arith.mulf %70, %70 : vector<16x32xf32>
    %cst_29 = arith.constant dense<0.000000e+00> : vector<16xf32>
    %73 = vector.multi_reduction <add>, %72, %cst_29 [1] : vector<16x32xf32> to vector<16xf32>
    %74 = vector.shape_cast %73 : vector<16xf32> to vector<16x1xf32>
    %cst_30 = arith.constant 3.200000e+01 : f32
    %75 = vector.broadcast %cst_30 : f32 to vector<16x1xf32>
    %76 = arith.divf %74, %75 : vector<16x1xf32>
    %cst_31 = arith.constant 9.99999997E-7 : f32
    %77 = vector.broadcast %cst_31 : f32 to vector<16x1xf32>
    %78 = arith.addf %76, %77 : vector<16x1xf32>
    %79 = math.rsqrt %78 : vector<16x1xf32>
    %80 = vector.broadcast %79 : vector<16x1xf32> to vector<16x32xf32>
    %81 = arith.mulf %70, %80 : vector<16x32xf32>
    %82 = vector.broadcast %71 : vector<1x32xf32> to vector<16x32xf32>
    %83 = arith.mulf %81, %82 : vector<16x32xf32>
    %c72 = arith.constant 72 : index
    %c0_32 = arith.constant 0 : index
    %84 = vector.load %arg1[%c72, %c0_32] : memref<520x32xf32, #tpu.memory_space<vmem>>, vector<32x32xf32>
    %cst_33 = arith.constant dense<0.000000e+00> : vector<16x32xf32>
    %85 = tpu.matmul %83, %84, %cst_33 {dimension_numbers = #tpu.dot_dimension_numbers<[1], [0], [0], [1], [0, 0, 1, 1], [], []>} : vector<16x32xf32>, vector<32x32xf32>, vector<16x32xf32> -> vector<16x32xf32>
    %c136 = arith.constant 136 : index
    %c0_34 = arith.constant 0 : index
    %86 = vector.load %arg1[%c136, %c0_34] : memref<520x32xf32, #tpu.memory_space<vmem>>, vector<32x32xf32>
    %cst_35 = arith.constant dense<0.000000e+00> : vector<16x32xf32>
    %87 = tpu.matmul %85, %86, %cst_35 {dimension_numbers = #tpu.dot_dimension_numbers<[1], [0], [0], [1], [0, 0, 1, 1], [], []>} : vector<16x32xf32>, vector<32x32xf32>, vector<16x32xf32> -> vector<16x32xf32>
    %c24 = arith.constant 24 : index
    %c0_36 = arith.constant 0 : index
    %88 = vector.load %arg1[%c24, %c0_36] : memref<520x32xf32, #tpu.memory_space<vmem>>, vector<1x32xf32>
    %89 = vector.broadcast %88 : vector<1x32xf32> to vector<16x32xf32>
    %90 = arith.addf %87, %89 : vector<16x32xf32>
    %91 = arith.addf %90, %83 : vector<16x32xf32>
    %c64 = arith.constant 64 : index
    %c0_37 = arith.constant 0 : index
    %92 = vector.load %arg2[%c64, %c0_37] : memref<96x256xf32, #tpu.memory_space<vmem>>, vector<32x256xf32>
    %cst_38 = arith.constant dense<0.000000e+00> : vector<16x256xf32>
    %93 = tpu.matmul %91, %92, %cst_38 {dimension_numbers = #tpu.dot_dimension_numbers<[1], [0], [0], [1], [0, 0, 1, 1], [], []>} : vector<16x32xf32>, vector<32x256xf32>, vector<16x256xf32> -> vector<16x256xf32>
    %94 = vector.extract_strided_slice %93 {offsets = [0, 0], sizes = [16, 128], strides = [1, 1]} : vector<16x256xf32> to vector<16x128xf32>
    %95 = arith.negf %94 : vector<16x128xf32>
    %96 = math.exp %95 : vector<16x128xf32>
    %cst_39 = arith.constant 1.000000e+00 : f32
    %97 = vector.broadcast %cst_39 : f32 to vector<16x128xf32>
    %98 = arith.addf %97, %96 : vector<16x128xf32>
    %99 = arith.divf %97, %98 : vector<16x128xf32>
    %100 = arith.mulf %94, %99 : vector<16x128xf32>
    %c64_i32 = arith.constant 64 : i32
    %101 = tpu.dynamic_rotate %94 by %c64_i32 dim 1 : vector<16x128xf32>, i32 -> vector<16x128xf32>
    %102 = arith.mulf %100, %101 : vector<16x128xf32>
    %c200 = arith.constant 200 : index
    %c0_40 = arith.constant 0 : index
    %103 = vector.load %arg1[%c200, %c0_40] : memref<520x32xf32, #tpu.memory_space<vmem>>, vector<128x32xf32>
    %cst_41 = arith.constant dense<0.000000e+00> : vector<16x32xf32>
    %104 = tpu.matmul %102, %103, %cst_41 {dimension_numbers = #tpu.dot_dimension_numbers<[1], [0], [0], [1], [0, 0, 1, 1], [], []>} : vector<16x128xf32>, vector<128x32xf32>, vector<16x32xf32> -> vector<16x32xf32>
    %105 = arith.addf %70, %104 : vector<16x32xf32>
    %c0_42 = arith.constant 0 : index
    %c0_43 = arith.constant 0 : index
    %106 = vector.load %arg3[%c0_42, %c0_43] : memref<16x32xf32, #tpu.memory_space<vmem>>, vector<16x32xf32>
    tpu.vector_store %arg3[%c0_42, %c0_43], %105 {strides = array<i32>} : memref<16x32xf32, #tpu.memory_space<vmem>>, vector<16x32xf32>,
    return
  }
}

</mosaic_0001>

<bundles_post_ra>
// kernel: llama_adapter_decoder_layer.1
= control target key start
LH: loop header
LB: loop body
LE: loop exit
PB: predicated region body
PF: predicated region fallthrough
CT: control target
= control target key end

     0   :  { %vm20_vm0 = vcmask 261120   ;;  %s2277_s0 = inlined_call_operand.vmem [shape: f32[16,32], index: 0, kind: input, shape index: {}]   ;;  %s2278_s1 = inlined_call_operand.vmem [shape: f32[520,32], index: 1, kind: input, shape index: {}]   ;;  %s2279_s2 = inlined_call_operand.vmem [shape: f32[96,256], index: 2, kind: input, shape index: {}]   ;;  %s2280_s3 = inlined_call_operand.hbm [shape: f32[16,32], index: 3, kind: output, shape index: {}]  }
   0x1   :  { %v1878_v0 = vld [vmem:[%s2277_s0] sm:$0xff]  ;;  %v1883_v1 = vld [vmem:[%s2277_s0 + $0x8] sm:$0xff] }
   0x2   :  { %8 = vsyncpa [#allocation3], 0  ;;  %v18_v2 = vmul.f32 %v1878_v0, %v1878_v0  ;;  %v19_v3 = vmul.f32 %v1883_v1, %v1883_v1  ;;  %v42_v6 = vld [vmem:[%s2278_s1 + $0x28] sm:$0xff]  ;;  %v43_v7 = vld [vmem:[%s2278_s1 + $0x30] sm:$0xff]  ;;  %v1849_v58 = vmov 0.0   ;;  %vm355_vm1 = vcmask 130048  }
   0x3   :  { %v44_v8 = vld [vmem:[%s2278_s1 + $0x38] sm:$0xff]  ;;  %v1649_v9 = vpack.c.bf16 %v43_v7, %v42_v6  ;;  %v45_v10 = vld [vmem:[%s2278_s1 + $0x40] sm:$0xff]  ;;  %v146_v25 = vld [vmem:[%s2278_s1 + $0x68] sm:$0xff]  ;;  %316 = vmatprep.mubr.f32.mxu0 %v1849_v58  ;;  %s1850_s8 = smov 96   ;;  %s1851_s26 = smov 64  }
   0x4   :  { %v21_v4 = vsel %vm20_vm0, %v18_v2, 0.0  ;;  %v24_v5 = vsel %vm20_vm0, %v19_v3, 0.0  ;;  %v1653_v11 = vpack.c.bf16 %v45_v10, %v44_v8  ;;  %v1384_v19 = vld [vmem:[%s2278_s1] ss:$0 sm:$0xff]  ;;  %v147_v26 = vld [vmem:[%s2278_s1 + $0x70] sm:$0xff]  ;;  %v148_v28 = vld [vmem:[%s2278_s1 + $0x78] sm:$0xff] }
   0x5   :  { %22 = vadd.xlane.f32.xlu0 %v21_v4  ;;  %1650 = vmatprep.subr.bf16.mxu1 %v1649_v9  ;;  %v1657_v27 = vpack.c.bf16 %v147_v26, %v146_v25  ;;  %v149_v29 = vld [vmem:[%s2278_s1 + $0x80] sm:$0xff]  ;;  %v239_v31 = vld [vmem:[%s2279_s2 + $0x8] sm:$0xff]  ;;  %v241_v32 = vld [vmem:[%s2279_s2 + $0x18] sm:$0xff] }
   0x6   :  { %1652 = vmatpush3.bf16.msra.mxu1 %v1649_v9  ;;  %v1661_v30 = vpack.c.bf16 %v149_v29, %v148_v28  ;;  %v238_v33 = vld [vmem:[%s2279_s2] sm:$0xff]  ;;  %v1665_v34 = vpack.c.bf16 %v241_v32, %v239_v31  ;;  %v240_v35 = vld [vmem:[%s2279_s2 + $0x10] sm:$0xff]  ;;  %v243_v52 = vld [vmem:[%s2279_s2 + $0x28] sm:$0xff] }
   0x7   :  { %1654 = vmatprep.subr.bf16.mxu1 %v1653_v11  ;;  %v1667_v36 = vpack.c.bf16 %v240_v35, %v238_v33  ;;  %v1385_v37 = vld [vmem:[%s2278_s1 + $0x20] ss:$0 sm:$0xff]  ;;  %v245_v53 = vld [vmem:[%s2279_s2 + $0x38] sm:$0xff]  ;;  %v244_v56 = vld [vmem:[%s2279_s2 + $0x30] sm:$0xff] }
   0x8   :  { %1666 = vmatprep.subr.bf16.mxu0 %v1665_v34  ;;  %v1669_v54 = vpack.c.bf16 %v245_v53, %v243_v52  ;;  %v242_v55 = vld [vmem:[%s2279_s2 + $0x20] sm:$0xff]  ;;  %v1390_v59 = vld [vmem:[%s2278_s1 + $0x10] ss:$0 sm:$0xff]  ;;  %v347_v4 = vld [vmem:[%s2278_s1 + $0x1c8] sm:$0xff] }
   0x9   :  { %25 = vadd.xlane.f32.xlu0 %v24_v5  ;;  %1668 = vmatpush1.bf16.msra.mxu0 %v1667_v36  ;;  %v1671_v57 = vpack.c.bf16 %v244_v56, %v242_v55  ;;  %v329_v5 = vld [vmem:[%s2279_s2 + $0x40] sm:$0xff]  ;;  %v352_v25 = vld [vmem:[%s2278_s1 + $0x1f0] sm:$0xff]  ;;  %v353_v26 = vld [vmem:[%s2278_s1 + $0x1f8] sm:$0xff] }
   0xa   :  { %1656 = vmatpush3.bf16.msra.mxu1 %v1653_v11  ;;  %1670 = vmatprep.subr.bf16.mxu0 %v1669_v54  ;;  %v333_v6 = vld [vmem:[%s2279_s2 + $0x60] sm:$0xff]  ;;  %v330_v11 = vld [vmem:[%s2279_s2 + $0x50] sm:$0xff]  ;;  %vm1678_vm2 = vmpackc.low %vm20_vm0, %vm20_vm0 }
   0xb   :  { %1658 = vmatprep.subr.bf16.mxu1 %v1657_v27  ;;  %v2010_v32 = vld [vmem:[%s2278_s1 + $0x148] sm:$0xff]  ;;  %v2015_v33 = vld [vmem:[%s2278_s1 + $0x150] sm:$0xff] }
   0xc   :  { %v494_v56 = vld [vmem:[%s2278_s1 + $0x190] sm:$0xff] }
   0xd   :  { %1672 = vmatpush1.bf16.msra.mxu0 %v1671_v57  ;;  %v493_v57 = vld [vmem:[%s2278_s1 + $0x188] sm:$0xff] }
  0x92   :  { %v23_v12 = vpop.xlane.xlu0 %22 }
  0x93   :  { %v28_v13 = vmul.f32 0.03125, %v23_v12  ;;  %v334_v12 = vld [vmem:[%s2279_s2 + $0x70] sm:$0xff] }
  0x95   :  { %v30_v14 = vadd.f32 1e-06, %v28_v13 }
  0x96   :  { %v26_v15 = vpop.xlane.xlu0 %25 }
  0x97   :  { %1769 = vrsqrt.f32 %v30_v14  ;;  %v29_v16 = vmul.f32 0.03125, %v26_v15 }
  0x99   :  { %v31_v17 = vadd.f32 1e-06, %v29_v16 }
  0x9b   :  { %1771 = vrsqrt.f32 %v31_v17 }
  0xa1   :  { %v1770_v18 = vpop.eup %1769 }
  0xa2   :  { %v34_v20 = vmul.f32 %v1770_v18, %v1878_v0 }
  0xa4   :  { %v40_v21 = vmul.f32 %v1384_v19, %v34_v20 }
  0xa5   :  { %v1772_v22 = vpop.eup %1771 }
  0xa6   :  { %v35_v23 = vmul.f32 %v1772_v22, %v1883_v1  ;;  %1519 = vmatprep.mubr.msk.f32.mxu1 %vm20_vm0, %v40_v21  ;;  %v349_v22 = vld [vmem:[%s2278_s1 + $0x1d8] sm:$0xff] }
  0xa8   :  { %v41_v24 = vmul.f32 %v1384_v19, %v35_v23  ;;  %v350_v23 = vld [vmem:[%s2278_s1 + $0x1e0] sm:$0xff] }
  0xaa   :  { %1520 = vmatmul.mubr.msk.f32.vlgmr.msra.gmra.mrb[0].mxu1 %vm20_vm0, %v41_v24 }
  0xab   :  { %1660 = vmatpush3.bf16.msra.mxu1 %v1657_v27  ;;  %v354_v27 = vld [vmem:[%s2278_s1 + $0x200] sm:$0xff] }
  0xac   :  { %1662 = vmatprep.subr.bf16.mxu1 %v1661_v30 }
  0xaf   :  { %1664 = vmatpush3.bf16.msra.mxu1 %v1661_v30 }
 0x17d   :  { %v1521_v38 = vpop.f32.mrb[0].mxu1 }
 0x17e   :  { %v129_v39 = vadd.f32 %v1521_v38, %v1385_v37  ;;  %v123_v40 = vpop.f32.mrb[1].mxu1  ;;  %v2022_v38 = vld [vmem:[%s2278_s1 + $0x158] sm:$0xff] }
 0x17f   :  { %v124_v41 = vadd.f32 %v1385_v37, %v123_v40 }
 0x180   :  { %v1389_v42 = vmul.f32 -1.442695, %v129_v39 }
 0x181   :  { %v1388_v43 = vmul.f32 -1.442695, %v124_v41 }
 0x182   :  { %1773 = vpow2.f32 %v1389_v42 }
 0x183   :  { %1775 = vpow2.f32 %v1388_v43  ;;  %v2035_v43 = vld [vmem:[%s2278_s1 + $0x170] sm:$0xff] }
 0x18c   :  { %v1774_v44 = vpop.eup %1773 }
 0x18d   :  { %v1776_v45 = vpop.eup %1775  ;;  %v139_v46 = vadd.f32 1.0, %v1774_v44 }
 0x18e   :  { %v138_v47 = vadd.f32 1.0, %v1776_v45  ;;  %v2041_v45 = vld [vmem:[%s2278_s1 + $0x168] sm:$0xff] }
 0x18f   :  { %1777 = vrcp.f32 %v139_v46 }
 0x190   :  { %1779 = vrcp.f32 %v138_v47 }
 0x199   :  { %v1778_v48 = vpop.eup %1777 }
 0x19a   :  { %v1780_v49 = vpop.eup %1779  ;;  %v145_v51 = vmul.f32 %v1778_v48, %v129_v39  ;;  %v2027_v39 = vld [vmem:[%s2278_s1 + $0x160] sm:$0xff] }
 0x19b   :  { %v144_v50 = vmul.f32 %v1780_v49, %v124_v41 }
 0x19d   :  { %1530 = vmatprep.mubr.msk.f32.mxu1 %vm20_vm0, %v144_v50  ;;  %v2050_v50 = vld [vmem:[%s2278_s1 + $0x180] sm:$0xff] }
 0x19e   :  { %1531 = vmatmul.mubr.msk.f32.vlgmr.msra.gmra.mrb[2].mxu1 %vm20_vm0, %v145_v51  ;;  %v2055_v51 = vld [vmem:[%s2278_s1 + $0x178] sm:$0xff] }
 0x19f   :  { %1537 = vmatprep.mubr.msk.f32.mxu1 %vm355_vm1, %v347_v4 }
 0x271   :  { %v1532_v60 = vpop.f32.mrb[2].mxu1 }
 0x272   :  { %v227_v61 = vpop.f32.mrb[3].mxu1  ;;  %v233_v63 = vadd.f32 %v1532_v60, %v1390_v59 }
 0x273   :  { %v228_v62 = vadd.f32 %v1390_v59, %v227_v61 }
 0x274   :  { %v237_v3 = vadd.f32 %v233_v63, %v41_v24  ;;  %v351_v24 = vld [vmem:[%s2278_s1 + $0x1e8] sm:$0xff]  ;;  %v496_v63 = vld [vmem:[%s2278_s1 + $0x1a0] sm:$0xff] }
 0x275   :  { %v236_v2 = vadd.f32 %v228_v62, %v40_v21  ;;  %v348_v21 = vld [vmem:[%s2278_s1 + $0x1d0] sm:$0xff] }
 0x277   :  { %1393 = vmatmul.mubr.msk.f32.vlgmr.msra.gmra.mrb[0].mxu0 %vm20_vm0, %v236_v2 }
 0x278   :  { %322 = vmatprep.mubr.f32.mxu0 %v1849_v58 }
 0x27b   :  { %1394 = vmatmul.mubr.msk.f32.gmra.mrb[2].mxu0 %vm20_vm0, %v237_v3 }
 0x34a   :  { %v318_v7 = vpop.f32.mrb[0].mxu0 }
 0x34b   :  { %v331_v8 = vmul.f32 %v329_v5, %v318_v7  ;;  %v320_v9 = vpop.f32.mrb[1].mxu0  ;;  %v495_v5 = vld [vmem:[%s2278_s1 + $0x198] sm:$0xff] }
 0x34c   :  { %v335_v10 = vmul.f32 %v333_v6, %v320_v9 }
 0x34e   :  { %v337_v13 = vadd.f32 %v335_v10, %v331_v8  ;;  %v324_v14 = vpop.f32.mrb[2].mxu0  ;;  %v498_v10 = vld [vmem:[%s2278_s1 + $0x1b0] sm:$0xff] }
 0x34f   :  { %v332_v15 = vmul.f32 %v330_v11, %v324_v14  ;;  %v326_v16 = vpop.f32.mrb[3].mxu0 }
 0x350   :  { %v336_v17 = vmul.f32 %v334_v12, %v326_v16 }
 0x352   :  { %v338_v18 = vadd.f32 %v336_v17, %v332_v15  ;;  %v497_v15 = vld [vmem:[%s2278_s1 + $0x1a8] sm:$0xff] }
 0x354   :  { %v1974_v19 = vpack.i.bf16 %v338_v18, %v337_v13  ;;  %v1673_v20 = vpack.c.bf16 %v338_v18, %v337_v13 }
 0x356   :  { %1760 = vrot.lane.b32.xlu1 %v1974_v19, %s1850_s8  ;;  %1674 = vmatprep.subr.bf16.mxu1 %v1673_v20 }
 0x357   :  { %1676 = vmatpush3.bf16.msra.mxu1 %v1673_v20 }
 0x35a   :  { %1538 = vmatmul.mubr.msk.f32.vlgmr.msra.gmra.mrb[4].mxu1 %vm355_vm1, %v348_v21  ;;  %v499_v21 = vld [vmem:[%s2278_s1 + $0x1b8] sm:$0xff] }
 0x35b   :  { %1540 = vmatprep.mubr.msk.f32.mxu1 %vm355_vm1, %v349_v22 }
 0x35e   :  { %1541 = vmatmul.mubr.msk.f32.gmra.mrb[6].mxu1 %vm355_vm1, %v350_v23 }
 0x35f   :  { %1543 = vmatprep.mubr.msk.f32.mxu1 %vm355_vm1, %v351_v24  ;;  %v500_v24 = vld [vmem:[%s2278_s1 + $0x1c0] sm:$0xff] }
 0x362   :  { %1544 = vmatmul.mubr.msk.f32.gmra.mrb[8].mxu1 %vm355_vm1, %v352_v25 }
 0x363   :  { %1546 = vmatprep.mubr.msk.f32.mxu1 %vm355_vm1, %v353_v26 }
 0x366   :  { %1547 = vmatmul.mubr.msk.f32.gmra.mrb[10].mxu1 %vm355_vm1, %v354_v27 }
 0x3c8   :  { %v1761_v28 = vpop.permute.xlu1 %1760 }
 0x3c9   :  { %v1763_v29 = vunpack.i.h.bf16 %v1761_v28  ;;  %v1762_v30 = vunpack.i.l.bf16 %v1761_v28 }
 0x3cb   :  { %v1677_v31 = vpack.c.bf16 %v1763_v29, %v1762_v30 }
 0x3cd   :  { %1679 = vmatprep.subr.msk.bf16.mxu0 %vm1678_vm2, %v1677_v31  ;;  %1751 = vmatprep.subr.msk.bf16.mxu1 %vm1678_vm2, %v1677_v31 }
 0x3ce   :  { %1682 = vmatpush3.bf16.xpose.msk.msra.mxu0 %vm1678_vm2, %v1677_v31  ;;  %1752 = vmatpush3.bf16.xpose.msk.msra.mxu1 %vm1678_vm2, %v1677_v31 }
 0x42d   :  { %v1539_v34 = vpop.f32.mrb[4].mxu1 }
 0x42e   :  { %v446_v35 = vpop.f32.mrb[5].mxu1  ;;  %v486_v37 = vmul.f32 %v1539_v34, %v2015_v33 }
 0x42f   :  { %v485_v36 = vmul.f32 %v446_v35, %v2010_v32 }
 0x431   :  { %v1542_v40 = vpop.f32.mrb[6].mxu1  ;;  %1553 = vmatprep.mubr.msk.f32.mxu0 %vm20_vm0, %v485_v36 }
 0x432   :  { %v456_v41 = vpop.f32.mrb[7].mxu1  ;;  %1554 = vmatmul.mubr.msk.f32.vlgmr.msra.gmra.mrb[4].mxu0 %vm20_vm0, %v486_v37  ;;  %v488_v44 = vmul.f32 %v1542_v40, %v2027_v39 }
 0x433   :  { %v487_v42 = vmul.f32 %v456_v41, %v2022_v38 }
 0x435   :  { %1556 = vmatprep.mubr.msk.f32.mxu0 %vm20_vm0, %v487_v42  ;;  %v1545_v46 = vpop.f32.mrb[8].mxu1 }
 0x436   :  { %v490_v47 = vmul.f32 %v1545_v46, %v2035_v43  ;;  %1557 = vmatmul.mubr.msk.f32.gmra.mrb[6].mxu0 %vm20_vm0, %v488_v44  ;;  %v466_v48 = vpop.f32.mrb[9].mxu1 }
 0x437   :  { %v489_v49 = vmul.f32 %v466_v48, %v2041_v45 }
 0x439   :  { %1559 = vmatprep.mubr.msk.f32.mxu0 %vm20_vm0, %v489_v49  ;;  %v1548_v52 = vpop.f32.mrb[10].mxu1 }
 0x43a   :  { %1560 = vmatmul.mubr.msk.f32.gmra.mrb[8].mxu0 %vm20_vm0, %v490_v47  ;;  %v492_v53 = vmul.f32 %v1548_v52, %v2050_v50  ;;  %v476_v54 = vpop.f32.mrb[11].mxu1 }
 0x43b   :  { %v491_v55 = vmul.f32 %v476_v54, %v2055_v51 }
 0x43d   :  { %1562 = vmatprep.mubr.msk.f32.mxu1 %vm20_vm0, %v491_v55 }
 0x43e   :  { %1563 = vmatmul.mubr.msk.f32.vlgmr.msra.gmra.mrb[12].mxu1 %vm20_vm0, %v492_v53 }
 0x505   :  { %v1555_v59 = vpop.f32.mrb[4].mxu0 }
 0x506   :  { %v607_v60 = vadd.f32 %v1555_v59, %v494_v56  ;;  %v601_v61 = vpop.f32.mrb[5].mxu0 }
 0x507   :  { %v602_v62 = vadd.f32 %v601_v61, %v493_v57 }
 0x508   :  { %v643_v2 = vsel %vm355_vm1, %v607_v60, -inf }
 0x509   :  { %644 = vmax.xlane.f32.xlu0 %v643_v2  ;;  %v1558_v3 = vpop.f32.mrb[6].mxu0  ;;  %v640_v4 = vsel %vm355_vm1, %v602_v62, -inf }
 0x50a   :  { %v617_v6 = vadd.f32 %v1558_v3, %v496_v63  ;;  %641 = vmax.xlane.f32.xlu1 %v640_v4  ;;  %v611_v7 = vpop.f32.mrb[7].mxu0 }
 0x50b   :  { %v612_v8 = vadd.f32 %v611_v7, %v495_v5 }
 0x50c   :  { %v649_v9 = vsel %vm355_vm1, %v617_v6, -inf }
 0x50d   :  { %650 = vmax.xlane.f32.xlu0 %v649_v9  ;;  %v1561_v11 = vpop.f32.mrb[8].mxu0  ;;  %v646_v14 = vsel %vm355_vm1, %v612_v8, -inf }
 0x50e   :  { %v621_v12 = vpop.f32.mrb[9].mxu0  ;;  %v627_v13 = vadd.f32 %v1561_v11, %v498_v10 }
 0x50f   :  { %v622_v18 = vadd.f32 %v621_v12, %v497_v15 }
 0x510   :  { %v655_v20 = vsel %vm355_vm1, %v627_v13, -inf }
 0x511   :  { %647 = vmax.xlane.f32.xlu0 %v646_v14  ;;  %v1564_v16 = vpop.f32.mrb[12].mxu1  ;;  %v652_v23 = vsel %vm355_vm1, %v622_v18, -inf }
 0x512   :  { %v631_v17 = vpop.f32.mrb[13].mxu1  ;;  %v637_v25 = vadd.f32 %v1564_v16, %v500_v24 }
 0x513   :  { %v632_v22 = vadd.f32 %v631_v17, %v499_v21 }
 0x514   :  { %v661_v27 = vsel %vm355_vm1, %v637_v25, -inf }
 0x515   :  { %656 = vmax.xlane.f32.xlu0 %v655_v20  ;;  %v658_v26 = vsel %vm355_vm1, %v632_v22, -inf }
 0x519   :  { %653 = vmax.xlane.f32.xlu0 %v652_v23 }
 0x51d   :  { %659 = vmax.xlane.f32.xlu0 %v658_v26 }
 0x521   :  { %662 = vmax.xlane.f32.xlu0 %v661_v27 }
 0x596   :  { %v645_v28 = vpop.xlane.xlu0 %644 }
 0x597   :  { %v665_v29 = vsub.f32 %v607_v60, %v645_v28  ;;  %v642_v30 = vpop.xlane.xlu1 %641 }
 0x598   :  { %v664_v31 = vsub.f32 %v602_v62, %v642_v30 }
 0x599   :  { %v674_v34 = vmul.f32 1.442695, %v665_v29 }
 0x59a   :  { %v672_v35 = vmul.f32 1.442695, %v664_v31  ;;  %v651_v36 = vpop.xlane.xlu0 %650 }
 0x59b   :  { %v667_v37 = vsub.f32 %v617_v6, %v651_v36 }
 0x59c   :  { %1781 = vpow2.f32 %v672_v35 }
 0x59d   :  { %1783 = vpow2.f32 %v674_v34  ;;  %v678_v40 = vmul.f32 1.442695, %v667_v37 }
 0x59e   :  { %v648_v41 = vpop.xlane.xlu0 %647 }
 0x59f   :  { %v666_v42 = vsub.f32 %v612_v8, %v648_v41  ;;  %1785 = vpow2.f32 %v678_v40 }
 0x5a1   :  { %v676_v44 = vmul.f32 1.442695, %v666_v42 }
 0x5a2   :  { %v657_v46 = vpop.xlane.xlu0 %656 }
 0x5a3   :  { %1787 = vpow2.f32 %v676_v44  ;;  %v669_v47 = vsub.f32 %v627_v13, %v657_v46 }
 0x5a5   :  { %v682_v48 = vmul.f32 1.442695, %v669_v47 }
 0x5a6   :  { %v1782_v49 = vpop.eup %1781  ;;  %v654_v52 = vpop.xlane.xlu0 %653 }
 0x5a7   :  { %1789 = vpow2.f32 %v682_v48  ;;  %v668_v53 = vsub.f32 %v622_v18, %v654_v52  ;;  %v688_v54 = vsel %vm355_vm1, %v1782_v49, 0.0  ;;  %v1784_v55 = vpop.eup %1783  ;;  %v878_v52 = vld [vmem:[%s2278_s1 + $0xb0] sm:$0xff] }
 0x5a8   :  { %689 = vadd.xlane.f32.xlu0 %v688_v54  ;;  %v691_v60 = vsel %vm355_vm1, %v1784_v55, 0.0  ;;  %v879_v54 = vld [vmem:[%s2278_s1 + $0xb8] sm:$0xff] }
 0x5a9   :  { %v680_v56 = vmul.f32 1.442695, %v668_v53  ;;  %v1786_v61 = vpop.eup %1785 }
 0x5aa   :  { %v660_v57 = vpop.xlane.xlu0 %659  ;;  %v697_v5 = vsel %vm355_vm1, %v1786_v61, 0.0 }
 0x5ab   :  { %1791 = vpow2.f32 %v680_v56  ;;  %v670_v59 = vsub.f32 %v632_v22, %v660_v57 }
 0x5ac   :  { %692 = vadd.xlane.f32.xlu0 %v691_v60 }
 0x5ad   :  { %v1788_v62 = vpop.eup %1787  ;;  %v684_v63 = vmul.f32 1.442695, %v670_v59 }
 0x5ae   :  { %v663_v2 = vpop.xlane.xlu0 %662  ;;  %v694_v3 = vsel %vm355_vm1, %v1788_v62, 0.0 }
 0x5af   :  { %1793 = vpow2.f32 %v684_v63  ;;  %v671_v4 = vsub.f32 %v637_v25, %v663_v2  ;;  %695 = vadd.xlane.f32.xlu1 %v694_v3 }
 0x5b0   :  { %698 = vadd.xlane.f32.xlu0 %v697_v5 }
 0x5b1   :  { %v1790_v6 = vpop.eup %1789  ;;  %v686_v7 = vmul.f32 1.442695, %v671_v4 }
 0x5b2   :  { %v703_v8 = vsel %vm355_vm1, %v1790_v6, 0.0 }
 0x5b3   :  { %1795 = vpow2.f32 %v686_v7 }
 0x5b4   :  { %704 = vadd.xlane.f32.xlu0 %v703_v8 }
 0x5b5   :  { %v1792_v9 = vpop.eup %1791 }
 0x5b6   :  { %v700_v10 = vsel %vm355_vm1, %v1792_v9, 0.0 }
 0x5b7   :  { %701 = vadd.xlane.f32.xlu1 %v700_v10 }
 0x5b9   :  { %v1794_v11 = vpop.eup %1793 }
 0x5ba   :  { %v706_v12 = vsel %vm355_vm1, %v1794_v11, 0.0 }
 0x5bb   :  { %707 = vadd.xlane.f32.xlu1 %v706_v12 }
 0x5bd   :  { %v1796_v13 = vpop.eup %1795 }
 0x5be   :  { %v709_v14 = vsel %vm355_vm1, %v1796_v13, 0.0 }
 0x5bf   :  { %710 = vadd.xlane.f32.xlu0 %v709_v14 }
 0x5cc   :  { %1765 = vrot.lane.b32.xlu1 %v1974_v19, %s1851_s26 }
 0x635   :  { %v690_v15 = vpop.xlane.xlu0 %689 }
 0x636   :  { %1797 = vrcp.f32 %v690_v15 }
 0x639   :  { %v693_v16 = vpop.xlane.xlu0 %692 }
 0x63a   :  { %1799 = vrcp.f32 %v693_v16 }
 0x63c   :  { %v696_v18 = vpop.xlane.xlu1 %695 }
 0x63d   :  { %v699_v22 = vpop.xlane.xlu0 %698  ;;  %1801 = vrcp.f32 %v696_v18  ;;  %v989_v18 = vld [vmem:[%s2278_s1 + $0x58] sm:$0xff] }
 0x63e   :  { %1803 = vrcp.f32 %v699_v22 }
 0x640   :  { %v1798_v17 = vpop.eup %1797 }
 0x641   :  { %v720_v20 = vmul.f32 %v1798_v17, %v1782_v49  ;;  %v705_v24 = vpop.xlane.xlu0 %704  ;;  %v877_v49 = vld [vmem:[%s2278_s1 + $0xa8] sm:$0xff] }
 0x642   :  { %v1687_v53 = vpack.c.bf16 %v878_v52, %v877_v49  ;;  %v1164_v49 = vld [vmem:[%s2279_s2 + $0x80] sm:$0xff] }
 0x643   :  { %1569 = vmatprep.mubr.msk.f32.mxu1 %vm355_vm1, %v720_v20 }
 0x644   :  { %v702_v21 = vpop.xlane.xlu1 %701  ;;  %v1800_v29 = vpop.eup %1799  ;;  %1688 = vmatprep.subr.bf16.mxu0 %v1687_v53 }
 0x645   :  { %1805 = vrcp.f32 %v702_v21  ;;  %v721_v31 = vmul.f32 %v1800_v29, %v1784_v55  ;;  %1690 = vmatpush3.bf16.msra.mxu0 %v1687_v53  ;;  %v880_v55 = vld [vmem:[%s2278_s1 + $0xc0] sm:$0xff]  ;;  %v1166_v53 = vld [vmem:[%s2279_s2 + $0x90] sm:$0xff] }
 0x646   :  { %1807 = vrcp.f32 %v705_v24  ;;  %v1691_v56 = vpack.c.bf16 %v880_v55, %v879_v54  ;;  %v990_v21 = vld [vmem:[%s2278_s1 + $0x60] sm:$0xff]  ;;  %v1073_v24 = vld [vmem:[%s2278_s1 + $0x90] sm:$0xff]  ;;  %v1713_v54 = vpack.c.bf16 %v1166_v53, %v1164_v49 }
 0x647   :  { %v1802_v30 = vpop.eup %1801  ;;  %v1699_v22 = vpack.c.bf16 %v990_v21, %v989_v18  ;;  %v1285_v18 = vld [vmem:[%s2278_s1 + $0x128] sm:$0xff] }
 0x648   :  { %v708_v23 = vpop.xlane.xlu1 %707  ;;  %v1804_v34 = vpop.eup %1803  ;;  %v722_v35 = vmul.f32 %v1802_v30, %v1788_v62  ;;  %1692 = vmatprep.subr.bf16.mxu0 %v1691_v56 }
 0x649   :  { %1809 = vrcp.f32 %v708_v23  ;;  %v723_v37 = vmul.f32 %v1804_v34, %v1786_v61  ;;  %1694 = vmatpush3.bf16.msra.mxu0 %v1691_v56  ;;  %v1072_v23 = vld [vmem:[%s2278_s1 + $0x88] sm:$0xff] }
 0x64c   :  { %v1766_v25 = vpop.permute.xlu1 %1765  ;;  %v711_v28 = vpop.xlane.xlu0 %710 }
 0x64d   :  { %v1768_v26 = vunpack.i.h.bf16 %v1766_v25  ;;  %v1767_v27 = vunpack.i.l.bf16 %v1766_v25  ;;  %1811 = vrcp.f32 %v711_v28  ;;  %v1074_v25 = vld [vmem:[%s2278_s1 + $0x98] sm:$0xff] }
 0x64f   :  { %v1683_v19 = vpack.c.bf16 %v1768_v26, %v1767_v27  ;;  %v1806_v36 = vpop.eup %1805  ;;  %v1703_v26 = vpack.c.bf16 %v1073_v24, %v1072_v23  ;;  %v1075_v27 = vld [vmem:[%s2278_s1 + $0xa0] sm:$0xff] }
 0x650   :  { %v1808_v40 = vpop.eup %1807  ;;  %v724_v41 = vmul.f32 %v1806_v36, %v1792_v9  ;;  %v1288_v23 = vld [vmem:[%s2278_s1 + $0x140] sm:$0xff] }
 0x651   :  { %1684 = vmatprep.subr.bf16.mxu1 %v1683_v19  ;;  %v725_v44 = vmul.f32 %v1808_v40, %v1790_v6  ;;  %1704 = vmatprep.subr.bf16.mxu0 %v1703_v26 }
 0x652   :  { %1686 = vmatpush3.bf16.msra.mxu1 %v1683_v19  ;;  %v1707_v19 = vpack.c.bf16 %v1075_v27, %v1074_v25 }
 0x653   :  { %v1810_v42 = vpop.eup %1809 }
 0x654   :  { %v726_v47 = vmul.f32 %v1810_v42, %v1794_v11 }
 0x655   :  { %1570 = vmatmul.mubr.msk.f32.vlgmr.msra.gmra.mrb[14].mxu1 %vm355_vm1, %v721_v31 }
 0x656   :  { %1572 = vmatprep.mubr.msk.f32.mxu1 %vm355_vm1, %v722_v35 }
 0x657   :  { %v1812_v46 = vpop.eup %1811 }
 0x658   :  { %v727_v48 = vmul.f32 %v1812_v46, %v1796_v13 }
 0x659   :  { %1573 = vmatmul.mubr.msk.f32.gmra.mrb[16].mxu1 %vm355_vm1, %v723_v37  ;;  %v1423_v37 = vld [vmem:[%s2278_s1 + $0x8] ss:$0 sm:$0xff] }
 0x65a   :  { %1575 = vmatprep.mubr.msk.f32.mxu1 %vm355_vm1, %v724_v41 }
 0x65d   :  { %1576 = vmatmul.mubr.msk.f32.gmra.mrb[18].mxu1 %vm355_vm1, %v725_v44 }
 0x65e   :  { %1578 = vmatprep.mubr.msk.f32.mxu1 %vm355_vm1, %v726_v47  ;;  %v1165_v47 = vld [vmem:[%s2279_s2 + $0x88] sm:$0xff] }
 0x661   :  { %1579 = vmatmul.mubr.msk.f32.gmra.mrb[20].mxu1 %vm355_vm1, %v727_v48  ;;  %v1167_v48 = vld [vmem:[%s2279_s2 + $0x98] sm:$0xff] }
 0x662   :  { %v1711_v52 = vpack.c.bf16 %v1167_v48, %v1165_v47 }
 0x728   :  { %v1571_v57 = vpop.f32.mrb[14].mxu1 }
 0x729   :  { %v824_v59 = vpop.f32.mrb[15].mxu1  ;;  %v864_v61 = vmul.f32 %v1571_v57, %v2015_v33  ;;  %v1169_v57 = vld [vmem:[%s2279_s2 + $0xa8] sm:$0xff] }
 0x72a   :  { %v863_v2 = vmul.f32 %v824_v59, %v2010_v32  ;;  %v1171_v59 = vld [vmem:[%s2279_s2 + $0xb8] sm:$0xff] }
 0x72c   :  { %v1574_v60 = vpop.f32.mrb[16].mxu1 }
 0x72d   :  { %v866_v62 = vmul.f32 %v1574_v60, %v2027_v39  ;;  %v834_v63 = vpop.f32.mrb[17].mxu1  ;;  %v1715_v60 = vpack.c.bf16 %v1171_v59, %v1169_v57 }
 0x72e   :  { %v865_v3 = vmul.f32 %v834_v63, %v2022_v38 }
 0x72f   :  { %v872_v4 = vadd.f32 %v866_v62, %v864_v61  ;;  %v1168_v61 = vld [vmem:[%s2279_s2 + $0xa0] sm:$0xff]  ;;  %v1170_v62 = vld [vmem:[%s2279_s2 + $0xb0] sm:$0xff] }
 0x730   :  { %v871_v5 = vadd.f32 %v865_v3, %v863_v2  ;;  %v1577_v6 = vpop.f32.mrb[18].mxu1  ;;  %v1717_v63 = vpack.c.bf16 %v1170_v62, %v1168_v61  ;;  %v1426_v2 = vld [vmem:[%s2278_s1 + $0x18] ss:$0 sm:$0xff] }
 0x731   :  { %v868_v7 = vmul.f32 %v1577_v6, %v2035_v43  ;;  %v844_v8 = vpop.f32.mrb[19].mxu1 }
 0x732   :  { %v867_v9 = vmul.f32 %v844_v8, %v2041_v45 }
 0x733   :  { %v874_v10 = vadd.f32 %v872_v4, %v868_v7 }
 0x734   :  { %v873_v11 = vadd.f32 %v871_v5, %v867_v9  ;;  %v1580_v12 = vpop.f32.mrb[20].mxu1  ;;  %v1273_v9 = vld [vmem:[%s2278_s1 + $0xc8] sm:$0xff] }
 0x735   :  { %v870_v33 = vmul.f32 %v1580_v12, %v2050_v50  ;;  %v854_v13 = vpop.f32.mrb[21].mxu1 }
 0x736   :  { %v869_v39 = vmul.f32 %v854_v13, %v2055_v51  ;;  %v1277_v13 = vld [vmem:[%s2278_s1 + $0xe8] sm:$0xff] }
 0x737   :  { %v876_v14 = vadd.f32 %v874_v10, %v870_v33  ;;  %v1274_v10 = vld [vmem:[%s2278_s1 + $0xd0] sm:$0xff] }
 0x738   :  { %v875_v32 = vadd.f32 %v873_v11, %v869_v39  ;;  %v1275_v11 = vld [vmem:[%s2278_s1 + $0xd8] sm:$0xff]  ;;  %v1719_v12 = vpack.c.bf16 %v1274_v10, %v1273_v9  ;;  %v1278_v39 = vld [vmem:[%s2278_s1 + $0xf0] sm:$0xff] }
 0x73a   :  { %1589 = vmatprep.mubr.msk.f32.mxu0 %vm20_vm0, %v875_v32  ;;  %v1279_v32 = vld [vmem:[%s2278_s1 + $0xf8] sm:$0xff] }
 0x73b   :  { %1590 = vmatmul.mubr.msk.f32.vlgmr.msra.gmra.mrb[10].mxu0 %vm20_vm0, %v876_v14  ;;  %v1727_v14 = vpack.c.bf16 %v1278_v39, %v1277_v13 }
 0x73c   :  { %1706 = vmatpush3.bf16.msra.mxu0 %v1703_v26 }
 0x73d   :  { %1708 = vmatprep.subr.bf16.mxu0 %v1707_v19 }
 0x740   :  { %1710 = vmatpush3.bf16.msra.mxu0 %v1707_v19 }
 0x741   :  { %1720 = vmatprep.subr.bf16.mxu0 %v1719_v12 }
 0x80e   :  { %v1591_v38 = vpop.f32.mrb[10].mxu0 }
 0x80f   :  { %v953_v15 = vpop.f32.mrb[11].mxu0  ;;  %v2136_v43 = vadd.f32 %v1591_v38, %v1883_v1  ;;  %v987_v1 = vld [vmem:[%s2278_s1 + $0x48] sm:$0xff]  ;;  %v1280_v38 = vld [vmem:[%s2278_s1 + $0x100] sm:$0xff] }
 0x810   :  { %v2139_v45 = vadd.f32 %v953_v15, %v1878_v0  ;;  %v988_v0 = vld [vmem:[%s2278_s1 + $0x50] sm:$0xff]  ;;  %v1731_v15 = vpack.c.bf16 %v1280_v38, %v1279_v32 }
 0x811   :  { %v966_v51 = vmul.f32 %v2136_v43, %v2136_v43  ;;  %v1695_v20 = vpack.c.bf16 %v988_v0, %v987_v1  ;;  %v1284_v1 = vld [vmem:[%s2278_s1 + $0x120] sm:$0xff] }
 0x812   :  { %v965_v50 = vmul.f32 %v2139_v45, %v2139_v45 }
 0x813   :  { %v970_v17 = vsel %vm20_vm0, %v966_v51, 0.0  ;;  %1696 = vmatprep.subr.bf16.mxu1 %v1695_v20 }
 0x814   :  { %v967_v16 = vsel %vm20_vm0, %v965_v50, 0.0  ;;  %1698 = vmatpush3.bf16.msra.mxu1 %v1695_v20  ;;  %v1281_v50 = vld [vmem:[%s2278_s1 + $0x108] sm:$0xff]  ;;  %v1286_v20 = vld [vmem:[%s2278_s1 + $0x130] sm:$0xff] }
 0x815   :  { %968 = vadd.xlane.f32.xlu0 %v967_v16  ;;  %1700 = vmatprep.subr.bf16.mxu1 %v1699_v22  ;;  %v1282_v16 = vld [vmem:[%s2278_s1 + $0x110] sm:$0xff]  ;;  %v1743_v21 = vpack.c.bf16 %v1286_v20, %v1285_v18 }
 0x816   :  { %v1735_v51 = vpack.c.bf16 %v1282_v16, %v1281_v50 }
 0x818   :  { %1702 = vmatpush3.bf16.msra.mxu1 %v1699_v22  ;;  %v1287_v22 = vld [vmem:[%s2278_s1 + $0x138] sm:$0xff] }
 0x819   :  { %971 = vadd.xlane.f32.xlu0 %v970_v17  ;;  %1712 = vmatprep.subr.bf16.mxu1 %v1711_v52  ;;  %v1283_v17 = vld [vmem:[%s2278_s1 + $0x118] sm:$0xff]  ;;  %v1747_v24 = vpack.c.bf16 %v1288_v23, %v1287_v22 }
 0x81a   :  { %v1739_v0 = vpack.c.bf16 %v1284_v1, %v1283_v17 }
 0x8a2   :  { %v969_v28 = vpop.xlane.xlu0 %968 }
 0x8a3   :  { %v973_v29 = vmul.f32 0.03125, %v969_v28 }
 0x8a5   :  { %v975_v30 = vadd.f32 1e-06, %v973_v29 }
 0x8a6   :  { %v972_v31 = vpop.xlane.xlu0 %971 }
 0x8a7   :  { %1813 = vrsqrt.f32 %v975_v30  ;;  %v974_v34 = vmul.f32 0.03125, %v972_v31 }
 0x8a9   :  { %v976_v35 = vadd.f32 1e-06, %v974_v34 }
 0x8ab   :  { %1815 = vrsqrt.f32 %v976_v35 }
 0x8b1   :  { %v1814_v36 = vpop.eup %1813 }
 0x8b2   :  { %v979_v40 = vmul.f32 %v1814_v36, %v2139_v45 }
 0x8b4   :  { %v985_v41 = vmul.f32 %v1423_v37, %v979_v40 }
 0x8b5   :  { %v1816_v42 = vpop.eup %1815 }
 0x8b6   :  { %v980_v44 = vmul.f32 %v1816_v42, %v2136_v43  ;;  %1600 = vmatprep.mubr.msk.f32.mxu1 %vm20_vm0, %v985_v41 }
 0x8b8   :  { %v986_v46 = vmul.f32 %v1423_v37, %v980_v44 }
 0x8ba   :  { %1601 = vmatmul.mubr.msk.f32.vlgmr.msra.gmra.mrb[22].mxu1 %vm20_vm0, %v986_v46 }
 0x8bb   :  { %1242 = vmatprep.mubr.f32.mxu1 %v1849_v58  ;;  %1714 = vmatpush1.bf16.msra.mxu1 %v1713_v54 }
 0x8bc   :  { %1716 = vmatprep.subr.bf16.mxu1 %v1715_v60 }
 0x8bf   :  { %1718 = vmatpush1.bf16.msra.mxu1 %v1717_v63 }
 0x98d   :  { %v1602_v55 = vpop.f32.mrb[22].mxu1 }
 0x98e   :  { %v1063_v56 = vpop.f32.mrb[23].mxu1 }
 0x98f   :  { %1611 = vmatprep.mubr.msk.f32.mxu0 %vm20_vm0, %v1063_v56 }
 0x990   :  { %1612 = vmatmul.mubr.msk.f32.vlgmr.msra.gmra.mrb[12].mxu0 %vm20_vm0, %v1602_v55 }
 0x991   :  { %1722 = vmatpush3.bf16.msra.mxu0 %v1719_v12 }
 0xa63   :  { %v1613_v3 = vpop.f32.mrb[12].mxu0 }
 0xa64   :  { %v1153_v4 = vpop.f32.mrb[13].mxu0  ;;  %v1159_v6 = vadd.f32 %v1613_v3, %v1426_v2 }
 0xa65   :  { %v1154_v5 = vadd.f32 %v1426_v2, %v1153_v4 }
 0xa66   :  { %v1163_v8 = vadd.f32 %v1159_v6, %v986_v46 }
 0xa67   :  { %v1162_v7 = vadd.f32 %v1154_v5, %v985_v41 }
 0xa69   :  { %1429 = vmatmul.mubr.msk.f32.vlgmr.msra.gmra.mrb[24].mxu1 %vm20_vm0, %v1162_v7 }
 0xa6a   :  { %1247 = vmatprep.mubr.f32.mxu1 %v1849_v58  ;;  %v1276_v58 = vld [vmem:[%s2278_s1 + $0xe0] sm:$0xff]  ;;  %s1852_s1 = smov [#allocation2]  }
 0xa6b   :  { %v1723_v33 = vpack.c.bf16 %v1276_v58, %v1275_v11 }
 0xa6d   :  { %1430 = vmatmul.mubr.msk.f32.gmra.mrb[26].mxu1 %vm20_vm0, %v1163_v8  ;;  %1724 = vmatprep.subr.bf16.mxu0 %v1723_v33 }
 0xa6e   :  { %1726 = vmatpush3.bf16.msra.mxu0 %v1723_v33 }
 0xa6f   :  { %1728 = vmatprep.subr.bf16.mxu0 %v1727_v14 }
 0xa72   :  { %1730 = vmatpush3.bf16.msra.mxu0 %v1727_v14 }
 0xa73   :  { %1732 = vmatprep.subr.bf16.mxu0 %v1731_v15 }
 0xa76   :  { %1734 = vmatpush3.bf16.msra.mxu0 %v1731_v15 }
 0xa77   :  { %1736 = vmatprep.subr.bf16.mxu0 %v1735_v51 }
 0xa7a   :  { %1738 = vmatpush3.bf16.msra.mxu0 %v1735_v51 }
 0xa7b   :  { %1740 = vmatprep.subr.bf16.mxu0 %v1739_v0 }
 0xa7e   :  { %1742 = vmatpush3.bf16.msra.mxu0 %v1739_v0 }
 0xa7f   :  { %1744 = vmatprep.subr.bf16.mxu0 %v1743_v21 }
 0xa82   :  { %1746 = vmatpush3.bf16.msra.mxu0 %v1743_v21 }
 0xa83   :  { %1748 = vmatprep.subr.bf16.mxu0 %v1747_v24 }
 0xa86   :  { %1750 = vmatpush3.bf16.msra.mxu0 %v1747_v24 }
 0xb3c   :  { %v1244_v25 = vpop.f32.mrb[24].mxu1 }
 0xb3d   :  { %1267 = vrot.lane.b32.xlu0 %v1244_v25, %s1851_s26  ;;  %v1246_v26 = vpop.f32.mrb[25].mxu1  ;;  %v1431_v28 = vmul.f32 -1.442695, %v1244_v25 }
 0xb3f   :  { %1817 = vpow2.f32 %v1431_v28 }
 0xb40   :  { %v1249_v27 = vpop.f32.mrb[26].mxu1 }
 0xb41   :  { %1269 = vrot.lane.b32.xlu1 %v1249_v27, %s1851_s26  ;;  %v1251_v19 = vpop.f32.mrb[27].mxu1  ;;  %v1432_v29 = vmul.f32 -1.442695, %v1249_v27  ;;  %s1373_s26 = sshll.u32 %s1852_s1, 4  ;;  %s1374_s26 = int_to_ptr.vmem [resolvable:$true] %s1373_s26 }
 0xb42   :  { %s1825_s19 = scalar_lea.vmem %s1374_s26, 256  ;;  %p1830_p1 = scmp.lt.s32.totalorder %s1374_s26, %s1374_s26 }
 0xb43   :  { %1819 = vpow2.f32 %v1432_v29  ;;  %p1826_p0 = scmp.ne.s32.totalorder %s1374_s26, %s1825_s19  ;;  %p1831_p2 = scmp.lt.s32.totalorder %s1825_s19, %s1825_s19 }
 0xb45   :  { %p1832_p3 = por %p1831_p2, %p1830_p1 }
 0xb47   :  { %p1833_p4 = pnand %p1832_p3, %p1826_p0 }
 0xb49   :  { %v1818_v30 = vpop.eup %1817 }
 0xb4a   :  { %v1259_v31 = vadd.f32 1.0, %v1818_v30 }
 0xb4c   :  { %1821 = vrcp.f32 %v1259_v31 }
 0xb4d   :  { %v1820_v34 = vpop.eup %1819 }
 0xb4e   :  { %v1260_v35 = vadd.f32 1.0, %v1820_v34 }
 0xb50   :  { %1823 = vrcp.f32 %v1260_v35 }
 0xb56   :  { %v1822_v36 = vpop.eup %1821 }
 0xb57   :  { %v1265_v37 = vmul.f32 %v1822_v36, %v1244_v25 }
 0xb5a   :  { %v1824_v40 = vpop.eup %1823 }
 0xb5b   :  { %v1266_v44 = vmul.f32 %v1824_v40, %v1249_v27 }
 0xbaf   :  { %v1268_v41 = vpop.permute.xlu0 %1267 }
 0xbb0   :  { %v1271_v42 = vmul.f32 %v1268_v41, %v1265_v37 }
 0xbb2   :  { %1646 = vmatprep.mubr.f32.mxu0 %v1271_v42 }
 0xbb3   :  { %v1270_v46 = vpop.permute.xlu1 %1269 }
 0xbb4   :  { %v1272_v47 = vmul.f32 %v1270_v46, %v1266_v44 }
 0xbb6   :  { %1647 = vmatmul.mubr.f32.vlgmr.msra.gmra.mrb[14].mxu0 %v1272_v47 }
 0xc89   :  { %v1648_v48 = vpop.f32.mrb[14].mxu0 }
 0xc8a   :  { %v1365_v49 = vadd.f32 %v1648_v48, %v2136_v43  ;;  %v1355_v52 = vpop.f32.mrb[15].mxu0 }
 0xc8b   :  { %v1364_v53 = vadd.f32 %v1355_v52, %v2139_v45 }
 0xc8c   :  { %1367 = vst.msk [vmem:[#allocation2 + $0x8] sm:$0xff] %vm20_vm0, %v1365_v49 }
 0xc8d   :  { %1366 = vst.msk [vmem:[#allocation2] sm:$0xff] %vm20_vm0, %v1364_v53 }
 0xc8e   :  { %1836 = shalt.err (!%p1833_p4)
}
 0xc8f   :  { %s1837_s22 = scalar_lea.hbm %s2280_s3, 256 }
 0xc90   :  { %p1838_p5 = scmp.ne.s32.totalorder %s2280_s3, %s1837_s22  ;;  %p1841_p6 = scmp.lt.u32.totalorder %s1837_s22, %s2280_s3 }
 0xc92   :  { %p1843_p7 = pnand %p1841_p6, %p1838_p5 }
 0xc94   :  { %1846 = shalt.err (!%p1843_p7)
}
 0xc95   :  { %s1853_s28 = smov 128   ;;  %s1854_s29 = smov 8  }
 0xc96   :  { %1379 = dma.vmem_to_hbm [thread:$0]  %s1374_s26, 256, %s2280_s3, [#allocation3], %s1853_s28, %s1853_s28, %s1854_s29  }
 0xc97   :  { %1847 = dma.done.wait [#allocation3], 256  }
 0xc98   :  { %1848 = vsyncadd [#allocation3], 4294967040 }
 0xc99   :  { %1383 = vsyncpa [#allocation3], 1 }

</bundles_post_ra>
